<compile_context>
chip_gen: v7x
topology: tpu7x:2x2x1
jax: 0.10.0
libtpu: 0.0.40
codegen_flags: <defaults>
</compile_context>

<pallas_src>
import functools

import jax
import jax.numpy as jnp
from jax.experimental import pallas as pl
from jax.experimental.pallas import tpu as pltpu


def _laf_kernel(t_end, krylov_dim, s_ref, omega_t_ref, o_ref):
    Bt, C, N = s_ref.shape
    M = Bt * C

    s = s_ref[...].astype(jnp.float32)      # [Bt, C, N]   S0 (f32 working set)
    omega_t = omega_t_ref[...]              # [N, N]       Omega^T, bf16, resident

    def mean_free(x):                       # Pi_0 (reduce over label axis)
        return x - jnp.mean(x, axis=1, keepdims=True)

    def fitness(x):                         # F(S) = Omega @ S  (one big MXU matmul)
        y = jnp.dot(x.reshape(M, N).astype(jnp.bfloat16), omega_t,
                    preferred_element_type=jnp.float32)
        return y.reshape(Bt, C, N)

    def replicator(x):                      # R_{S0}[x]
        sx = s * x
        return sx - s * jnp.sum(sx, axis=1, keepdims=True)

    # v0 = mean_free(fitness(s0))
    v0 = mean_free(fitness(s))

    # phi(s0, v0) ~= phi1(t*A) v0,  A = Pi_0 Omega R_{S0}
    # TODO(synk): reference odeint.phi uses an Arnoldi/Krylov projection of
    # phi1; here a truncated Taylor polynomial of the same degree is used.
    w = v0
    acc = v0                                # k = 0 term (coeff 1/1!)
    fact = 1.0
    for k in range(1, krylov_dim):
        w = t_end * mean_free(fitness(replicator(w)))   # (t*A)^k v0
        fact = fact * float(k + 1)
        acc = acc + w * (1.0 / fact)

    # v_end = mean_free(phi(...));  return t_end * v_end
    v_end = mean_free(acc)
    o_ref[...] = (t_end * v_end).astype(o_ref.dtype)


def laf_forward(s0_nchw, omega, t_end=3.0, krylov_dim=5, batch_block=None):
    B, C, H, W = s0_nchw.shape
    N = H * W

    # Fold as much of the batch as possible into a single grid step / matmul.
    Bt = B if batch_block is None else min(int(batch_block), B)
    assert B % Bt == 0, "batch_block must divide B"
    num_blocks = B // Bt

    s = s0_nchw.reshape(B, C, N)
    # bf16 Omega^T: halves HBM traffic + VMEM footprint of the only large
    # operand and enables the single-pass bf16 MXU path.
    omega_t = omega.T.astype(jnp.bfloat16)

    # Advisory cost hint for XLA scheduling around the custom call.
    cost = pl.CostEstimate(
        flops=int(2 * B * C * N * N * krylov_dim),
        transcendentals=0,
        bytes_accessed=int(N * N * 2 + 2 * B * C * N * s0_nchw.dtype.itemsize),
    )

    # Scoped-VMEM estimate: single-buffered bf16 Omega^T + double-buffered
    # in/out batch blocks + f32 working values (s, w, acc, temporaries).
    block_bytes = Bt * C * N * 4
    vmem_est = N * N * 2 + 4 * block_bytes + 6 * block_bytes
    vmem_limit = None
    if vmem_est > 32 * 1024 * 1024:
        # Keep under the v7x 64 MiB physical cap; v5e/v6e have more headroom.
        vmem_limit = min(int(vmem_est * 1.25), 64 * 1024 * 1024)

    kernel = functools.partial(_laf_kernel, float(t_end), int(krylov_dim))
    out = pl.pallas_call(
        kernel,
        out_shape=jax.ShapeDtypeStruct((B, C, N), s0_nchw.dtype),
        grid_spec=pltpu.PrefetchScalarGridSpec(
            num_scalar_prefetch=0,
            grid=(num_blocks,),
            in_specs=[
                # Bt images per step, folded into the matmul M dim in-kernel.
                pl.BlockSpec((Bt, C, N), lambda b: (b, 0, 0)),
                # Omega^T: constant index_map -> single-buffer (no pipelining win).
                pl.BlockSpec((N, N), lambda b: (0, 0),
                             pipeline_mode=pl.Buffered(1)),
            ],
            out_specs=pl.BlockSpec((Bt, C, N), lambda b: (b, 0, 0)),
        ),
        compiler_params=pltpu.CompilerParams(
            dimension_semantics=("parallel",),
            vmem_limit_bytes=vmem_limit,
        ),
        cost_estimate=cost,
    )(s, omega_t)
    return out.reshape(B, C, H, W)


def laf_reference(s0_nchw, omega, t_end=3.0, krylov_dim=5):
    """Pure-JAX f32 reference with identical math (for a sanity check)."""
    B, C, H, W = s0_nchw.shape
    N = H * W
    s = s0_nchw.reshape(B, C, N).astype(jnp.float32)

    mean_free = lambda x: x - jnp.mean(x, axis=1, keepdims=True)
    fit = lambda x: jnp.einsum("nm,bcm->bcn", omega, x)
    repl = lambda x: s * x - s * jnp.sum(s * x, axis=1, keepdims=True)

    v0 = mean_free(fit(s))
    w, acc, fact = v0, v0, 1.0
    for k in range(1, krylov_dim):
        w = t_end * mean_free(fit(repl(w)))
        fact *= float(k + 1)
        acc = acc + w / fact
    return (t_end * mean_free(acc)).reshape(B, C, H, W).astype(s0_nchw.dtype)


if __name__ == "__main__":
    key = jax.random.PRNGKey(0)
    k_s, k_w = jax.random.split(key)

    B, C, H, W = 2, 8, 16, 16
    N = H * W

    # s0: assignment vectors on the simplex (softmax over the label axis).
    s0 = jax.nn.softmax(
        jax.random.normal(k_s, (B, C, H, W), dtype=jnp.float32), axis=1)
    # Deterministic "parameters": row-stochastic fitness/averaging weights.
    omega = jax.nn.softmax(
        0.5 * jax.random.normal(k_w, (N, N), dtype=jnp.float32), axis=-1)

    out = jax.block_until_ready(laf_forward(s0, omega))

    ref = laf_reference(s0, omega)
    assert out.shape == (B, C, H, W)
    # Tolerance reflects bf16 MXU operands (f32 reference, f32 accumulation).
    assert jnp.allclose(out, ref, rtol=2e-2, atol=2e-3), float(
        jnp.max(jnp.abs(out - ref)))

    print("KERNEL_OK")
</pallas_src>

<mosaic_0001>
module attributes {stable_mosaic.version = 11 : i64} {
  func.func @_laf_kernel(%arg0: i32, %arg1: memref<2x8x256xf32, #tpu.memory_space<vmem>>, %arg2: memref<256x256xbf16, #tpu.memory_space<vmem>>, %arg3: memref<2x8x256xf32, #tpu.memory_space<vmem>>) attributes {dimension_semantics = [#tpu.dimension_semantics<parallel>], iteration_bounds = array<i64: 1>, scalar_prefetch = 0 : i64, scratch_operands = 0 : i64, tpu.core_type = #tpu.core_type<tc>, window_params = [{transform_indices = @transform_0, window_bounds = array<i64: 2, 8, 256>}, {pipeline_mode = #tpu.pipeline_mode<synchronous>, transform_indices = @transform_1, window_bounds = array<i64: 256, 256>}, {transform_indices = @transform_2, window_bounds = array<i64: 2, 8, 256>}]} {
    %c0 = arith.constant 0 : index
    %c0_0 = arith.constant 0 : index
    %c0_1 = arith.constant 0 : index
    %0 = vector.load %arg1[%c0, %c0_0, %c0_1] : memref<2x8x256xf32, #tpu.memory_space<vmem>>, vector<2x8x256xf32>
    %c0_2 = arith.constant 0 : index
    %c0_3 = arith.constant 0 : index
    %1 = vector.load %arg2[%c0_2, %c0_3] : memref<256x256xbf16, #tpu.memory_space<vmem>>, vector<256x256xbf16>
    %2 = vector.shape_cast %0 : vector<2x8x256xf32> to vector<16x256xf32>
    %3 = arith.truncf %2 : vector<16x256xf32> to vector<16x256xbf16>
    %cst = arith.constant dense<0.000000e+00> : vector<16x256xf32>
    %4 = tpu.matmul %3, %1, %cst {dimension_numbers = #tpu.dot_dimension_numbers<[1], [0], [0], [1], [0, 0, 1, 1], [], []>} : vector<16x256xbf16>, vector<256x256xbf16>, vector<16x256xf32> -> vector<16x256xf32>
    %5 = vector.shape_cast %4 : vector<16x256xf32> to vector<2x8x256xf32>
    %cst_4 = arith.constant dense<0.000000e+00> : vector<2x256xf32>
    %6 = vector.multi_reduction <add>, %5, %cst_4 [1] : vector<2x8x256xf32> to vector<2x256xf32>
    %7 = vector.shape_cast %6 : vector<2x256xf32> to vector<2x1x256xf32>
    %cst_5 = arith.constant 8.000000e+00 : f32
    %8 = vector.broadcast %cst_5 : f32 to vector<2x1x256xf32>
    %9 = arith.divf %7, %8 : vector<2x1x256xf32>
    %10 = vector.broadcast %9 : vector<2x1x256xf32> to vector<2x8x256xf32>
    %11 = arith.subf %5, %10 : vector<2x8x256xf32>
    %12 = arith.mulf %0, %11 : vector<2x8x256xf32>
    %cst_6 = arith.constant dense<0.000000e+00> : vector<2x256xf32>
    %13 = vector.multi_reduction <add>, %12, %cst_6 [1] : vector<2x8x256xf32> to vector<2x256xf32>
    %14 = vector.shape_cast %13 : vector<2x256xf32> to vector<2x1x256xf32>
    %15 = vector.broadcast %14 : vector<2x1x256xf32> to vector<2x8x256xf32>
    %16 = arith.mulf %0, %15 : vector<2x8x256xf32>
    %17 = arith.subf %12, %16 : vector<2x8x256xf32>
    %18 = vector.shape_cast %17 : vector<2x8x256xf32> to vector<16x256xf32>
    %19 = arith.truncf %18 : vector<16x256xf32> to vector<16x256xbf16>
    %cst_7 = arith.constant dense<0.000000e+00> : vector<16x256xf32>
    %20 = tpu.matmul %19, %1, %cst_7 {dimension_numbers = #tpu.dot_dimension_numbers<[1], [0], [0], [1], [0, 0, 1, 1], [], []>} : vector<16x256xbf16>, vector<256x256xbf16>, vector<16x256xf32> -> vector<16x256xf32>
    %21 = vector.shape_cast %20 : vector<16x256xf32> to vector<2x8x256xf32>
    %cst_8 = arith.constant dense<0.000000e+00> : vector<2x256xf32>
    %22 = vector.multi_reduction <add>, %21, %cst_8 [1] : vector<2x8x256xf32> to vector<2x256xf32>
    %23 = vector.shape_cast %22 : vector<2x256xf32> to vector<2x1x256xf32>
    %cst_9 = arith.constant 8.000000e+00 : f32
    %24 = vector.broadcast %cst_9 : f32 to vector<2x1x256xf32>
    %25 = arith.divf %23, %24 : vector<2x1x256xf32>
    %26 = vector.broadcast %25 : vector<2x1x256xf32> to vector<2x8x256xf32>
    %27 = arith.subf %21, %26 : vector<2x8x256xf32>
    %cst_10 = arith.constant 3.000000e+00 : f32
    %28 = vector.broadcast %cst_10 : f32 to vector<2x8x256xf32>
    %29 = arith.mulf %28, %27 : vector<2x8x256xf32>
    %cst_11 = arith.constant 5.000000e-01 : f32
    %30 = vector.broadcast %cst_11 : f32 to vector<2x8x256xf32>
    %31 = arith.mulf %29, %30 : vector<2x8x256xf32>
    %32 = arith.addf %11, %31 : vector<2x8x256xf32>
    %33 = arith.mulf %0, %29 : vector<2x8x256xf32>
    %cst_12 = arith.constant dense<0.000000e+00> : vector<2x256xf32>
    %34 = vector.multi_reduction <add>, %33, %cst_12 [1] : vector<2x8x256xf32> to vector<2x256xf32>
    %35 = vector.shape_cast %34 : vector<2x256xf32> to vector<2x1x256xf32>
    %36 = vector.broadcast %35 : vector<2x1x256xf32> to vector<2x8x256xf32>
    %37 = arith.mulf %0, %36 : vector<2x8x256xf32>
    %38 = arith.subf %33, %37 : vector<2x8x256xf32>
    %39 = vector.shape_cast %38 : vector<2x8x256xf32> to vector<16x256xf32>
    %40 = arith.truncf %39 : vector<16x256xf32> to vector<16x256xbf16>
    %cst_13 = arith.constant dense<0.000000e+00> : vector<16x256xf32>
    %41 = tpu.matmul %40, %1, %cst_13 {dimension_numbers = #tpu.dot_dimension_numbers<[1], [0], [0], [1], [0, 0, 1, 1], [], []>} : vector<16x256xbf16>, vector<256x256xbf16>, vector<16x256xf32> -> vector<16x256xf32>
    %42 = vector.shape_cast %41 : vector<16x256xf32> to vector<2x8x256xf32>
    %cst_14 = arith.constant dense<0.000000e+00> : vector<2x256xf32>
    %43 = vector.multi_reduction <add>, %42, %cst_14 [1] : vector<2x8x256xf32> to vector<2x256xf32>
    %44 = vector.shape_cast %43 : vector<2x256xf32> to vector<2x1x256xf32>
    %cst_15 = arith.constant 8.000000e+00 : f32
    %45 = vector.broadcast %cst_15 : f32 to vector<2x1x256xf32>
    %46 = arith.divf %44, %45 : vector<2x1x256xf32>
    %47 = vector.broadcast %46 : vector<2x1x256xf32> to vector<2x8x256xf32>
    %48 = arith.subf %42, %47 : vector<2x8x256xf32>
    %cst_16 = arith.constant 3.000000e+00 : f32
    %49 = vector.broadcast %cst_16 : f32 to vector<2x8x256xf32>
    %50 = arith.mulf %49, %48 : vector<2x8x256xf32>
    %cst_17 = arith.constant 0.166666672 : f32
    %51 = vector.broadcast %cst_17 : f32 to vector<2x8x256xf32>
    %52 = arith.mulf %50, %51 : vector<2x8x256xf32>
    %53 = arith.addf %32, %52 : vector<2x8x256xf32>
    %54 = arith.mulf %0, %50 : vector<2x8x256xf32>
    %cst_18 = arith.constant dense<0.000000e+00> : vector<2x256xf32>
    %55 = vector.multi_reduction <add>, %54, %cst_18 [1] : vector<2x8x256xf32> to vector<2x256xf32>
    %56 = vector.shape_cast %55 : vector<2x256xf32> to vector<2x1x256xf32>
    %57 = vector.broadcast %56 : vector<2x1x256xf32> to vector<2x8x256xf32>
    %58 = arith.mulf %0, %57 : vector<2x8x256xf32>
    %59 = arith.subf %54, %58 : vector<2x8x256xf32>
    %60 = vector.shape_cast %59 : vector<2x8x256xf32> to vector<16x256xf32>
    %61 = arith.truncf %60 : vector<16x256xf32> to vector<16x256xbf16>
    %cst_19 = arith.constant dense<0.000000e+00> : vector<16x256xf32>
    %62 = tpu.matmul %61, %1, %cst_19 {dimension_numbers = #tpu.dot_dimension_numbers<[1], [0], [0], [1], [0, 0, 1, 1], [], []>} : vector<16x256xbf16>, vector<256x256xbf16>, vector<16x256xf32> -> vector<16x256xf32>
    %63 = vector.shape_cast %62 : vector<16x256xf32> to vector<2x8x256xf32>
    %cst_20 = arith.constant dense<0.000000e+00> : vector<2x256xf32>
    %64 = vector.multi_reduction <add>, %63, %cst_20 [1] : vector<2x8x256xf32> to vector<2x256xf32>
    %65 = vector.shape_cast %64 : vector<2x256xf32> to vector<2x1x256xf32>
    %cst_21 = arith.constant 8.000000e+00 : f32
    %66 = vector.broadcast %cst_21 : f32 to vector<2x1x256xf32>
    %67 = arith.divf %65, %66 : vector<2x1x256xf32>
    %68 = vector.broadcast %67 : vector<2x1x256xf32> to vector<2x8x256xf32>
    %69 = arith.subf %63, %68 : vector<2x8x256xf32>
    %cst_22 = arith.constant 3.000000e+00 : f32
    %70 = vector.broadcast %cst_22 : f32 to vector<2x8x256xf32>
    %71 = arith.mulf %70, %69 : vector<2x8x256xf32>
    %cst_23 = arith.constant 0.0416666679 : f32
    %72 = vector.broadcast %cst_23 : f32 to vector<2x8x256xf32>
    %73 = arith.mulf %71, %72 : vector<2x8x256xf32>
    %74 = arith.addf %53, %73 : vector<2x8x256xf32>
    %75 = arith.mulf %0, %71 : vector<2x8x256xf32>
    %cst_24 = arith.constant dense<0.000000e+00> : vector<2x256xf32>
    %76 = vector.multi_reduction <add>, %75, %cst_24 [1] : vector<2x8x256xf32> to vector<2x256xf32>
    %77 = vector.shape_cast %76 : vector<2x256xf32> to vector<2x1x256xf32>
    %78 = vector.broadcast %77 : vector<2x1x256xf32> to vector<2x8x256xf32>
    %79 = arith.mulf %0, %78 : vector<2x8x256xf32>
    %80 = arith.subf %75, %79 : vector<2x8x256xf32>
    %81 = vector.shape_cast %80 : vector<2x8x256xf32> to vector<16x256xf32>
    %82 = arith.truncf %81 : vector<16x256xf32> to vector<16x256xbf16>
    %cst_25 = arith.constant dense<0.000000e+00> : vector<16x256xf32>
    %83 = tpu.matmul %82, %1, %cst_25 {dimension_numbers = #tpu.dot_dimension_numbers<[1], [0], [0], [1], [0, 0, 1, 1], [], []>} : vector<16x256xbf16>, vector<256x256xbf16>, vector<16x256xf32> -> vector<16x256xf32>
    %84 = vector.shape_cast %83 : vector<16x256xf32> to vector<2x8x256xf32>
    %cst_26 = arith.constant dense<0.000000e+00> : vector<2x256xf32>
    %85 = vector.multi_reduction <add>, %84, %cst_26 [1] : vector<2x8x256xf32> to vector<2x256xf32>
    %86 = vector.shape_cast %85 : vector<2x256xf32> to vector<2x1x256xf32>
    %cst_27 = arith.constant 8.000000e+00 : f32
    %87 = vector.broadcast %cst_27 : f32 to vector<2x1x256xf32>
    %88 = arith.divf %86, %87 : vector<2x1x256xf32>
    %89 = vector.broadcast %88 : vector<2x1x256xf32> to vector<2x8x256xf32>
    %90 = arith.subf %84, %89 : vector<2x8x256xf32>
    %cst_28 = arith.constant 3.000000e+00 : f32
    %91 = vector.broadcast %cst_28 : f32 to vector<2x8x256xf32>
    %92 = arith.mulf %91, %90 : vector<2x8x256xf32>
    %cst_29 = arith.constant 0.00833333377 : f32
    %93 = vector.broadcast %cst_29 : f32 to vector<2x8x256xf32>
    %94 = arith.mulf %92, %93 : vector<2x8x256xf32>
    %95 = arith.addf %74, %94 : vector<2x8x256xf32>
    %cst_30 = arith.constant dense<0.000000e+00> : vector<2x256xf32>
    %96 = vector.multi_reduction <add>, %95, %cst_30 [1] : vector<2x8x256xf32> to vector<2x256xf32>
    %97 = vector.shape_cast %96 : vector<2x256xf32> to vector<2x1x256xf32>
    %cst_31 = arith.constant 8.000000e+00 : f32
    %98 = vector.broadcast %cst_31 : f32 to vector<2x1x256xf32>
    %99 = arith.divf %97, %98 : vector<2x1x256xf32>
    %100 = vector.broadcast %99 : vector<2x1x256xf32> to vector<2x8x256xf32>
    %101 = arith.subf %95, %100 : vector<2x8x256xf32>
    %cst_32 = arith.constant 3.000000e+00 : f32
    %102 = vector.broadcast %cst_32 : f32 to vector<2x8x256xf32>
    %103 = arith.mulf %102, %101 : vector<2x8x256xf32>
    %c0_33 = arith.constant 0 : index
    %c0_34 = arith.constant 0 : index
    %c0_35 = arith.constant 0 : index
    %104 = vector.load %arg3[%c0_33, %c0_34, %c0_35] : memref<2x8x256xf32, #tpu.memory_space<vmem>>, vector<2x8x256xf32>
    tpu.vector_store %arg3[%c0_33, %c0_34, %c0_35], %103 {strides = array<i32>} : memref<2x8x256xf32, #tpu.memory_space<vmem>>, vector<2x8x256xf32>,
    return
  }
  func.func @transform_0(%arg0: i32) -> (i32, i32, i32) {
    %c0_i32 = arith.constant 0 : i32
    %c0_i32_0 = arith.constant 0 : i32
    %c0_i32_1 = arith.constant 0 : i32
    return %arg0, %c0_i32, %c0_i32_0 : i32, i32, i32
  }
  func.func @transform_1(%arg0: i32) -> (i32, i32) {
    %c0_i32 = arith.constant 0 : i32
    %c0_i32_0 = arith.constant 0 : i32
    %c0_i32_1 = arith.constant 0 : i32
    return %c0_i32, %c0_i32_0 : i32, i32
  }
  func.func @transform_2(%arg0: i32) -> (i32, i32, i32) {
    %c0_i32 = arith.constant 0 : i32
    %c0_i32_0 = arith.constant 0 : i32
    %c0_i32_1 = arith.constant 0 : i32
    return %arg0, %c0_i32, %c0_i32_0 : i32, i32, i32
  }
}

</mosaic_0001>

<bundles_post_ra>
// kernel: tpu_custom_call.1
= control target key start
LH: loop header
LB: loop body
LE: loop exit
PB: predicated region body
PF: predicated region fallthrough
CT: control target
= control target key end

     0   :  { %7 = vsyncpa [#allocation3], 0  ;;  %s1419_s0 = inlined_call_operand.hbm [shape: f32[2,8,256], index: 0, kind: input, shape index: {}]   ;;  %s1420_s1 = inlined_call_operand.hbm [shape: bf16[256,256], index: 1, kind: input, shape index: {}]   ;;  %s1421_s2 = inlined_call_operand.hbm [shape: f32[2,8,256], index: 2, kind: output, shape index: {}]  }
   0x1   :  { %8 = vsyncpa [#allocation6], 0 }
   0x2   :  { %9 = vsyncpa [#allocation4], 0  ;;  %s1031_s9 = smov [#allocation2]   ;;  %s959_s13 = scalar_lea.hbm %s1419_s0, 512 }
   0x3   :  { %s15_s10 = sshll.u32 %s1031_s9, 4  ;;  %p960_p0 = scmp.ne.s32.totalorder %s1419_s0, %s959_s13  ;;  %s16_s10 = int_to_ptr.vmem [resolvable:$true] %s15_s10 }
   0x4   :  { %p963_p1 = scmp.lt.u32.totalorder %s959_s13, %s1419_s0 }
   0x6   :  { %p965_p2 = pnand %p963_p1, %p960_p0 }
   0x8   :  { %968 = shalt.err (!%p965_p2)
}
   0x9   :  { %s969_s18 = scalar_lea.vmem %s16_s10, 512  ;;  %p974_p4 = scmp.lt.s32.totalorder %s16_s10, %s16_s10 }
   0xa   :  { %p970_p3 = scmp.ne.s32.totalorder %s16_s10, %s969_s18  ;;  %p975_p5 = scmp.lt.s32.totalorder %s969_s18, %s969_s18 }
   0xc   :  { %p976_p6 = por %p975_p5, %p974_p4 }
   0xe   :  { %p977_p7 = pnand %p976_p6, %p970_p3 }
  0x10   :  { %980 = shalt.err (!%p977_p7)
}
  0x11   :  { %s1032_s19 = smov 256   ;;  %s1033_s20 = smov 16  }
  0x12   :  { %21 = dma.hbm_to_vmem [thread:$0]  %s1419_s0, 512, %s16_s10, [#allocation3], %s1032_s19, %s1032_s19, %s1033_s20  }
  0x13   :  { %s1034_s23 = smov [#allocation5]   ;;  %s981_s27 = scalar_lea.hbm %s1420_s1, 4096 }
  0x14   :  { %s27_s24 = sshll.u32 %s1034_s23, 4  ;;  %p982_p8 = scmp.ne.s32.totalorder %s1420_s1, %s981_s27  ;;  %s28_s24 = int_to_ptr.vmem [resolvable:$true] %s27_s24 }
  0x15   :  { %p985_p9 = scmp.lt.u32.totalorder %s981_s27, %s1420_s1 }
  0x17   :  { %p987_p10 = pnand %p985_p9, %p982_p8 }
  0x19   :  { %990 = shalt.err (!%p987_p10)
}
  0x1a   :  { %s991_s4 = scalar_lea.vmem %s28_s24, 4096  ;;  %p996_p12 = scmp.lt.s32.totalorder %s28_s24, %s28_s24 }
  0x1b   :  { %p992_p11 = scmp.ne.s32.totalorder %s28_s24, %s991_s4  ;;  %p997_p13 = scmp.lt.s32.totalorder %s991_s4, %s991_s4 }
  0x1d   :  { %p998_p0 = por %p997_p13, %p996_p12 }
  0x1f   :  { %p999_p1 = pnand %p998_p0, %p992_p11 }
  0x21   :  { %1002 = shalt.err (!%p999_p1)
}
  0x22   :  { %s1035_s0 = smov 128   ;;  %s1036_s5 = smov 8  }
  0x23   :  { %33 = dma.hbm_to_vmem [thread:$0]  %s1420_s1, 4096, %s28_s24, [#allocation6], %s1035_s0, %s1035_s0, %s1036_s5  }
  0x24   :  { %1025 = dma.done.wait [#allocation3], 512  }
  0x25   :  { %1026 = vsyncadd [#allocation3], 4294966784 }
  0x26   :  { %1027 = dma.done.wait [#allocation6], 4096  }
  0x27   :  { %1028 = vsyncadd [#allocation6], 4294963200  ;;  %v1080_v0 = vld [vmem:[#allocation5 + $0x4] ss:$8 sps:$4 sm:$0xff]   ;;  %v1082_v1 = vld [vmem:[#allocation5] ss:$8 sps:$4 sm:$0xff]  }
  0x28   :  { %238 = vmatprep.subr.bf16.mxu0 %v1080_v0  ;;  %v1085_v2 = vld [vmem:[#allocation5 + $0x14] ss:$8 sps:$4 sm:$0xff]   ;;  %352 = vmatprep.subr.bf16.mxu1 %v1080_v0  ;;  %v1089_v3 = vld [vmem:[#allocation5 + $0x10] ss:$8 sps:$4 sm:$0xff]   ;;  %v1093_v4 = vld [vmem:[#allocation5 + $0x24] ss:$8 sps:$4 sm:$0xff]  }
  0x29   :  { %239 = vmatpush1.bf16.msra.mxu0 %v1082_v1  ;;  %353 = vmatpush1.bf16.msra.mxu1 %v1082_v1  ;;  %v1097_v5 = vld [vmem:[#allocation5 + $0x20] ss:$8 sps:$4 sm:$0xff]   ;;  %v1101_v6 = vld [vmem:[#allocation5 + $0x34] ss:$8 sps:$4 sm:$0xff]   ;;  %v1105_v7 = vld [vmem:[#allocation5 + $0x30] ss:$8 sps:$4 sm:$0xff]  }
  0x2a   :  { %240 = vmatprep.subr.bf16.mxu0 %v1085_v2  ;;  %354 = vmatprep.subr.bf16.mxu1 %v1085_v2  ;;  %v1109_v8 = vld [vmem:[#allocation5 + $0x44] ss:$8 sps:$4 sm:$0xff]   ;;  %v1113_v9 = vld [vmem:[#allocation5 + $0x40] ss:$8 sps:$4 sm:$0xff]   ;;  %v1117_v10 = vld [vmem:[#allocation5 + $0x54] ss:$8 sps:$4 sm:$0xff]  }
  0x2b   :  { %v1121_v11 = vld [vmem:[#allocation5 + $0x50] ss:$8 sps:$4 sm:$0xff]   ;;  %v1125_v12 = vld [vmem:[#allocation5 + $0x64] ss:$8 sps:$4 sm:$0xff]   ;;  %v1135_v16 = vld [vmem:[#allocation5 + $0x60] ss:$8 sps:$4 sm:$0xff]  }
  0x2c   :  { %v1128_v13 = vld [vmem:[#allocation2 + $0x8] sm:$0xff]  ;;  %v1130_v14 = vld [vmem:[#allocation2 + $0x18] sm:$0xff]  ;;  %v1209_v35 = vld [vmem:[#allocation2] sm:$0xff]  ;;  %s1037_s1 = smov [#allocation7]  }
  0x2d   :  { %241 = vmatpush1.bf16.msra.mxu0 %v1089_v3  ;;  %355 = vmatpush1.bf16.msra.mxu1 %v1089_v3  ;;  %v77_v15 = vpack.c.bf16 %v1130_v14, %v1128_v13  ;;  %v1139_v17 = vld [vmem:[#allocation5 + $0x74] ss:$8 sps:$4 sm:$0xff]   ;;  %v1143_v18 = vld [vmem:[#allocation5 + $0x70] ss:$8 sps:$4 sm:$0xff]   ;;  %v1147_v19 = vld [vmem:[#allocation5 + $0x84] ss:$8 sps:$4 sm:$0xff]  }
  0x2e   :  { %242 = vmatprep.subr.bf16.mxu0 %v1093_v4  ;;  %356 = vmatprep.subr.bf16.mxu1 %v1093_v4  ;;  %v1151_v20 = vld [vmem:[#allocation5 + $0x80] ss:$8 sps:$4 sm:$0xff]   ;;  %v1155_v21 = vld [vmem:[#allocation5 + $0x94] ss:$8 sps:$4 sm:$0xff]   ;;  %v1159_v22 = vld [vmem:[#allocation5 + $0x90] ss:$8 sps:$4 sm:$0xff]  }
  0x2f   :  { %270 = vmatprep.mubr.bf16.mxu0 %v77_v15  ;;  %v1163_v23 = vld [vmem:[#allocation5 + $0xa4] ss:$8 sps:$4 sm:$0xff]   ;;  %v1167_v24 = vld [vmem:[#allocation5 + $0xa0] ss:$8 sps:$4 sm:$0xff]   ;;  %v1171_v25 = vld [vmem:[#allocation5 + $0xb4] ss:$8 sps:$4 sm:$0xff]  }
  0x30   :  { %v1175_v26 = vld [vmem:[#allocation5 + $0xb0] ss:$8 sps:$4 sm:$0xff]   ;;  %v1179_v27 = vld [vmem:[#allocation5 + $0xc4] ss:$8 sps:$4 sm:$0xff]   ;;  %v1183_v28 = vld [vmem:[#allocation5 + $0xc0] ss:$8 sps:$4 sm:$0xff]  }
  0x31   :  { %243 = vmatpush1.bf16.msra.mxu0 %v1097_v5  ;;  %357 = vmatpush1.bf16.msra.mxu1 %v1097_v5  ;;  %v1187_v29 = vld [vmem:[#allocation5 + $0xd4] ss:$8 sps:$4 sm:$0xff]   ;;  %v1191_v30 = vld [vmem:[#allocation5 + $0xd0] ss:$8 sps:$4 sm:$0xff]   ;;  %v1195_v31 = vld [vmem:[#allocation5 + $0xe4] ss:$8 sps:$4 sm:$0xff]  }
  0x32   :  { %244 = vmatprep.subr.bf16.mxu0 %v1101_v6  ;;  %358 = vmatprep.subr.bf16.mxu1 %v1101_v6  ;;  %v1199_v32 = vld [vmem:[#allocation5 + $0xe0] ss:$8 sps:$4 sm:$0xff]   ;;  %v1203_v33 = vld [vmem:[#allocation5 + $0xf4] ss:$8 sps:$4 sm:$0xff]   ;;  %v1207_v34 = vld [vmem:[#allocation5 + $0xf0] ss:$8 sps:$4 sm:$0xff]  }
  0x33   :  { %1428 = vst [vmem:[#allocation11_spill] sm:$0xff] %v1207_v34  ;;  %v1211_v36 = vld [vmem:[#allocation2 + $0x10] sm:$0xff]  ;;  %s859_s8 = sshll.u32 %s1037_s1, 4  ;;  %s860_s8 = int_to_ptr.vmem [resolvable:$true] %s859_s8 }
  0x34   :  { %v76_v37 = vpack.c.bf16 %v1211_v36, %v1209_v35  ;;  %s1003_s9 = scalar_lea.vmem %s860_s8, 512  ;;  %p1008_p3 = scmp.lt.s32.totalorder %s860_s8, %s860_s8 }
  0x35   :  { %245 = vmatpush1.bf16.msra.mxu0 %v1105_v7  ;;  %359 = vmatpush1.bf16.msra.mxu1 %v1105_v7  ;;  %p1004_p2 = scmp.ne.s32.totalorder %s860_s8, %s1003_s9  ;;  %p1009_p4 = scmp.lt.s32.totalorder %s1003_s9, %s1003_s9 }
  0x36   :  { %246 = vmatprep.subr.bf16.mxu0 %v1109_v8  ;;  %360 = vmatprep.subr.bf16.mxu1 %v1109_v8 }
  0x37   :  { %p1010_p5 = por %p1009_p4, %p1008_p3 }
  0x39   :  { %247 = vmatpush1.bf16.msra.mxu0 %v1113_v9  ;;  %361 = vmatpush1.bf16.msra.mxu1 %v1113_v9  ;;  %p1011_p6 = pnand %p1010_p5, %p1004_p2 }
  0x3a   :  { %248 = vmatprep.subr.bf16.mxu0 %v1117_v10  ;;  %362 = vmatprep.subr.bf16.mxu1 %v1117_v10 }
  0x3d   :  { %249 = vmatpush1.bf16.msra.mxu0 %v1121_v11  ;;  %363 = vmatpush1.bf16.msra.mxu1 %v1121_v11 }
  0x3e   :  { %250 = vmatprep.subr.bf16.mxu0 %v1125_v12  ;;  %364 = vmatprep.subr.bf16.mxu1 %v1125_v12 }
  0x41   :  { %251 = vmatpush1.bf16.msra.mxu0 %v1135_v16  ;;  %365 = vmatpush1.bf16.msra.mxu1 %v1135_v16 }
  0x42   :  { %252 = vmatprep.subr.bf16.mxu0 %v1139_v17  ;;  %366 = vmatprep.subr.bf16.mxu1 %v1139_v17 }
  0x45   :  { %253 = vmatpush1.bf16.msra.mxu0 %v1143_v18  ;;  %367 = vmatpush1.bf16.msra.mxu1 %v1143_v18 }
  0x46   :  { %254 = vmatprep.subr.bf16.mxu0 %v1147_v19  ;;  %368 = vmatprep.subr.bf16.mxu1 %v1147_v19 }
  0x49   :  { %255 = vmatpush1.bf16.msra.mxu0 %v1151_v20  ;;  %369 = vmatpush1.bf16.msra.mxu1 %v1151_v20 }
  0x4a   :  { %256 = vmatprep.subr.bf16.mxu0 %v1155_v21  ;;  %370 = vmatprep.subr.bf16.mxu1 %v1155_v21 }
  0x4d   :  { %257 = vmatpush1.bf16.msra.mxu0 %v1159_v22  ;;  %371 = vmatpush1.bf16.msra.mxu1 %v1159_v22 }
  0x4e   :  { %258 = vmatprep.subr.bf16.mxu0 %v1163_v23  ;;  %372 = vmatprep.subr.bf16.mxu1 %v1163_v23 }
  0x51   :  { %259 = vmatpush1.bf16.msra.mxu0 %v1167_v24  ;;  %373 = vmatpush1.bf16.msra.mxu1 %v1167_v24 }
  0x52   :  { %260 = vmatprep.subr.bf16.mxu0 %v1171_v25  ;;  %374 = vmatprep.subr.bf16.mxu1 %v1171_v25 }
  0x55   :  { %261 = vmatpush1.bf16.msra.mxu0 %v1175_v26  ;;  %375 = vmatpush1.bf16.msra.mxu1 %v1175_v26 }
  0x56   :  { %262 = vmatprep.subr.bf16.mxu0 %v1179_v27  ;;  %376 = vmatprep.subr.bf16.mxu1 %v1179_v27 }
  0x59   :  { %263 = vmatpush1.bf16.msra.mxu0 %v1183_v28  ;;  %377 = vmatpush1.bf16.msra.mxu1 %v1183_v28 }
  0x5a   :  { %264 = vmatprep.subr.bf16.mxu0 %v1187_v29  ;;  %378 = vmatprep.subr.bf16.mxu1 %v1187_v29 }
  0x5d   :  { %265 = vmatpush1.bf16.msra.mxu0 %v1191_v30  ;;  %379 = vmatpush1.bf16.msra.mxu1 %v1191_v30 }
  0x5e   :  { %266 = vmatprep.subr.bf16.mxu0 %v1195_v31  ;;  %380 = vmatprep.subr.bf16.mxu1 %v1195_v31 }
  0x61   :  { %267 = vmatpush1.bf16.msra.mxu0 %v1199_v32  ;;  %381 = vmatpush1.bf16.msra.mxu1 %v1199_v32 }
  0x62   :  { %268 = vmatprep.subr.bf16.mxu0 %v1203_v33  ;;  %382 = vmatprep.subr.bf16.mxu1 %v1203_v33 }
  0x65   :  { %269 = vmatpush1.bf16.msra.mxu0 %v1207_v34  ;;  %383 = vmatpush1.bf16.msra.mxu1 %v1207_v34 }
  0x66   :  { %477 = vmatprep.subr.bf16.mxu0 %v1080_v0  ;;  %602 = vmatprep.subr.bf16.mxu1 %v1080_v0 }
  0x68   :  { %271 = vmatmul.mubr.bf16.vlgmr.msra.gmra.mrb[0].mxu0 %v76_v37 }
  0x69   :  { %478 = vmatpush1.bf16.msra.mxu0 %v1082_v1 }
  0x6a   :  { %479 = vmatprep.subr.bf16.mxu0 %v1085_v2 }
  0x6d   :  { %480 = vmatpush1.bf16.msra.mxu0 %v1089_v3 }
  0x6e   :  { %481 = vmatprep.subr.bf16.mxu0 %v1093_v4 }
  0x71   :  { %482 = vmatpush1.bf16.msra.mxu0 %v1097_v5 }
  0x72   :  { %483 = vmatprep.subr.bf16.mxu0 %v1101_v6 }
  0x75   :  { %484 = vmatpush1.bf16.msra.mxu0 %v1105_v7 }
  0x76   :  { %485 = vmatprep.subr.bf16.mxu0 %v1109_v8 }
  0x79   :  { %486 = vmatpush1.bf16.msra.mxu0 %v1113_v9 }
  0x7a   :  { %487 = vmatprep.subr.bf16.mxu0 %v1117_v10 }
  0x7d   :  { %488 = vmatpush1.bf16.msra.mxu0 %v1121_v11 }
  0x7e   :  { %489 = vmatprep.subr.bf16.mxu0 %v1125_v12 }
  0x81   :  { %490 = vmatpush1.bf16.msra.mxu0 %v1135_v16 }
  0x82   :  { %491 = vmatprep.subr.bf16.mxu0 %v1139_v17 }
  0x85   :  { %492 = vmatpush1.bf16.msra.mxu0 %v1143_v18 }
  0x86   :  { %493 = vmatprep.subr.bf16.mxu0 %v1147_v19 }
  0x89   :  { %494 = vmatpush1.bf16.msra.mxu0 %v1151_v20 }
  0x8a   :  { %495 = vmatprep.subr.bf16.mxu0 %v1155_v21 }
  0x8d   :  { %496 = vmatpush1.bf16.msra.mxu0 %v1159_v22 }
  0x8e   :  { %497 = vmatprep.subr.bf16.mxu0 %v1163_v23 }
  0x91   :  { %498 = vmatpush1.bf16.msra.mxu0 %v1167_v24 }
  0x92   :  { %499 = vmatprep.subr.bf16.mxu0 %v1171_v25 }
  0x95   :  { %500 = vmatpush1.bf16.msra.mxu0 %v1175_v26 }
  0x96   :  { %501 = vmatprep.subr.bf16.mxu0 %v1179_v27 }
  0x99   :  { %502 = vmatpush1.bf16.msra.mxu0 %v1183_v28 }
  0x9a   :  { %503 = vmatprep.subr.bf16.mxu0 %v1187_v29 }
  0x9d   :  { %504 = vmatpush1.bf16.msra.mxu0 %v1191_v30 }
  0x9e   :  { %505 = vmatprep.subr.bf16.mxu0 %v1195_v31 }
  0xa1   :  { %506 = vmatpush1.bf16.msra.mxu0 %v1199_v32 }
  0xa2   :  { %507 = vmatprep.subr.bf16.mxu0 %v1203_v33 }
  0xa5   :  { %508 = vmatpush1.bf16.msra.mxu0 %v1207_v34 }
  0xa6   :  { %727 = vmatprep.subr.bf16.mxu0 %v1080_v0 }
 0x13b   :  { %v272_v38 = vpop.f32.mrb[0].mxu0 }
 0x13c   :  { %v281_v39 = vrot.slane %v272_v38, 4  ;;  %v274_v40 = vpop.f32.mrb[1].mxu0 }
 0x13d   :  { %v287_v41 = vrot.slane %v274_v40, 4  ;;  %v276_v42 = vpop.f32.mrb[2].mxu0 }
 0x13e   :  { %v282_v43 = vadd.f32 %v281_v39, %v272_v38  ;;  %v293_v44 = vrot.slane %v276_v42, 4  ;;  %v278_v45 = vpop.f32.mrb[3].mxu0 }
 0x13f   :  { %v288_v46 = vadd.f32 %v287_v41, %v274_v40  ;;  %v299_v47 = vrot.slane %v278_v45, 4 }
 0x140   :  { %v283_v48 = vrot.slane %v282_v43, 2  ;;  %v294_v49 = vadd.f32 %v293_v44, %v276_v42 }
 0x141   :  { %v289_v50 = vrot.slane %v288_v46, 2  ;;  %v300_v51 = vadd.f32 %v299_v47, %v278_v45 }
 0x142   :  { %v284_v52 = vadd.f32 %v283_v48, %v282_v43  ;;  %v295_v53 = vrot.slane %v294_v49, 2 }
 0x143   :  { %v290_v54 = vadd.f32 %v289_v50, %v288_v46  ;;  %v301_v55 = vrot.slane %v300_v51, 2 }
 0x144   :  { %v285_v56 = vrot.slane %v284_v52, 1  ;;  %v296_v57 = vadd.f32 %v295_v53, %v294_v49 }
 0x145   :  { %v291_v58 = vrot.slane %v290_v54, 1  ;;  %v302_v59 = vadd.f32 %v301_v55, %v300_v51 }
 0x146   :  { %v286_v60 = vadd.f32 %v285_v56, %v284_v52  ;;  %v297_v61 = vrot.slane %v296_v57, 1 }
 0x147   :  { %v292_v62 = vadd.f32 %v291_v58, %v290_v54  ;;  %v303_v63 = vrot.slane %v302_v59, 1 }
 0x148   :  { %v306_v0 = vmul.f32 0.125, %v286_v60  ;;  %v298_v15 = vadd.f32 %v297_v61, %v296_v57 }
 0x149   :  { %v307_v37 = vmul.f32 0.125, %v292_v62  ;;  %v304_v39 = vadd.f32 %v303_v63, %v302_v59 }
 0x14a   :  { %v1254_v41 = vsub.f32 %v272_v38, %v306_v0  ;;  %v308_v44 = vmul.f32 0.125, %v298_v15 }
 0x14b   :  { %v1256_v47 = vsub.f32 %v274_v40, %v307_v37  ;;  %v309_v43 = vmul.f32 0.125, %v304_v39 }
 0x14c   :  { %1429 = vst [vmem:[#allocation12_spill] sm:$0xff] %v1254_v41  ;;  %v314_v46 = vmul.f32 %v1254_v41, %v1209_v35  ;;  %v1260_v48 = vsub.f32 %v276_v42, %v308_v44 }
 0x14d   :  { %1430 = vst [vmem:[#allocation13_spill] sm:$0xff] %v1256_v47  ;;  %v315_v49 = vmul.f32 %v1256_v47, %v1128_v13  ;;  %v1264_v50 = vsub.f32 %v278_v45, %v309_v43 }
 0x14e   :  { %1431 = vst [vmem:[#allocation14_spill] sm:$0xff] %v1260_v48  ;;  %v318_v51 = vrot.slane %v314_v46, 4  ;;  %v316_v52 = vmul.f32 %v1260_v48, %v1211_v36 }
 0x14f   :  { %1432 = vst [vmem:[#allocation15_spill] sm:$0xff] %v1264_v50  ;;  %v324_v38 = vrot.slane %v315_v49, 4  ;;  %v317_v40 = vmul.f32 %v1264_v50, %v1130_v14 }
 0x150   :  { %v319_v53 = vadd.f32 %v318_v51, %v314_v46  ;;  %v330_v54 = vrot.slane %v316_v52, 4 }
 0x151   :  { %v336_v55 = vrot.slane %v317_v40, 4  ;;  %v325_v56 = vadd.f32 %v324_v38, %v315_v49 }
 0x152   :  { %v320_v57 = vrot.slane %v319_v53, 2  ;;  %v331_v42 = vadd.f32 %v330_v54, %v316_v52 }
 0x153   :  { %v326_v58 = vrot.slane %v325_v56, 2  ;;  %v337_v59 = vadd.f32 %v336_v55, %v317_v40 }
 0x154   :  { %v332_v60 = vrot.slane %v331_v42, 2  ;;  %v321_v61 = vadd.f32 %v320_v57, %v319_v53 }
 0x155   :  { %v327_v45 = vadd.f32 %v326_v58, %v325_v56  ;;  %v338_v62 = vrot.slane %v337_v59, 2 }
 0x156   :  { %v322_v63 = vrot.slane %v321_v61, 1  ;;  %v333_v0 = vadd.f32 %v332_v60, %v331_v42 }
 0x157   :  { %v328_v15 = vrot.slane %v327_v45, 1  ;;  %v339_v37 = vadd.f32 %v338_v62, %v337_v59 }
 0x158   :  { %v323_v39 = vadd.f32 %v322_v63, %v321_v61  ;;  %v334_v44 = vrot.slane %v333_v0, 1 }
 0x159   :  { %v329_v43 = vadd.f32 %v328_v15, %v327_v45  ;;  %v340_v50 = vrot.slane %v339_v37, 1 }
 0x15a   :  { %v335_v51 = vadd.f32 %v334_v44, %v333_v0  ;;  %v342_v54 = vmul.f32 %v323_v39, %v1209_v35 }
 0x15b   :  { %v341_v48 = vadd.f32 %v340_v50, %v339_v37  ;;  %v343_v38 = vmul.f32 %v329_v43, %v1128_v13 }
 0x15c   :  { %v344_v55 = vmul.f32 %v335_v51, %v1211_v36  ;;  %v346_v42 = vsub.f32 %v314_v46, %v342_v54 }
 0x15d   :  { %v345_v53 = vmul.f32 %v341_v48, %v1130_v14  ;;  %v347_v57 = vsub.f32 %v315_v49, %v343_v38 }
 0x15e   :  { %v348_v56 = vsub.f32 %v316_v52, %v344_v55 }
 0x15f   :  { %v349_v58 = vsub.f32 %v317_v40, %v345_v53 }
 0x160   :  { %v350_v59 = vpack.c.bf16 %v348_v56, %v346_v42 }
 0x161   :  { %v351_v60 = vpack.c.bf16 %v349_v58, %v347_v57 }
 0x163   :  { %384 = vmatprep.mubr.bf16.mxu1 %v351_v60 }
 0x164   :  { %385 = vmatmul.mubr.bf16.vlgmr.msra.gmra.mrb[0].mxu1 %v350_v59 }
 0x165   :  { %603 = vmatpush1.bf16.msra.mxu1 %v1082_v1 }
 0x166   :  { %604 = vmatprep.subr.bf16.mxu1 %v1085_v2 }
 0x169   :  { %605 = vmatpush1.bf16.msra.mxu1 %v1089_v3 }
 0x16a   :  { %606 = vmatprep.subr.bf16.mxu1 %v1093_v4 }
 0x16d   :  { %607 = vmatpush1.bf16.msra.mxu1 %v1097_v5 }
 0x16e   :  { %608 = vmatprep.subr.bf16.mxu1 %v1101_v6 }
 0x171   :  { %609 = vmatpush1.bf16.msra.mxu1 %v1105_v7 }
 0x172   :  { %610 = vmatprep.subr.bf16.mxu1 %v1109_v8 }
 0x175   :  { %611 = vmatpush1.bf16.msra.mxu1 %v1113_v9 }
 0x176   :  { %612 = vmatprep.subr.bf16.mxu1 %v1117_v10 }
 0x179   :  { %613 = vmatpush1.bf16.msra.mxu1 %v1121_v11 }
 0x17a   :  { %614 = vmatprep.subr.bf16.mxu1 %v1125_v12 }
 0x17d   :  { %615 = vmatpush1.bf16.msra.mxu1 %v1135_v16 }
 0x17e   :  { %616 = vmatprep.subr.bf16.mxu1 %v1139_v17 }
 0x181   :  { %617 = vmatpush1.bf16.msra.mxu1 %v1143_v18 }
 0x182   :  { %618 = vmatprep.subr.bf16.mxu1 %v1147_v19 }
 0x185   :  { %619 = vmatpush1.bf16.msra.mxu1 %v1151_v20 }
 0x186   :  { %620 = vmatprep.subr.bf16.mxu1 %v1155_v21 }
 0x189   :  { %621 = vmatpush1.bf16.msra.mxu1 %v1159_v22 }
 0x18a   :  { %622 = vmatprep.subr.bf16.mxu1 %v1163_v23 }
 0x18d   :  { %623 = vmatpush1.bf16.msra.mxu1 %v1167_v24 }
 0x18e   :  { %624 = vmatprep.subr.bf16.mxu1 %v1171_v25 }
 0x191   :  { %625 = vmatpush1.bf16.msra.mxu1 %v1175_v26 }
 0x192   :  { %626 = vmatprep.subr.bf16.mxu1 %v1179_v27 }
 0x195   :  { %627 = vmatpush1.bf16.msra.mxu1 %v1183_v28 }
 0x196   :  { %628 = vmatprep.subr.bf16.mxu1 %v1187_v29 }
 0x199   :  { %629 = vmatpush1.bf16.msra.mxu1 %v1191_v30 }
 0x19a   :  { %630 = vmatprep.subr.bf16.mxu1 %v1195_v31 }
 0x19d   :  { %631 = vmatpush1.bf16.msra.mxu1 %v1199_v32 }
 0x19e   :  { %632 = vmatprep.subr.bf16.mxu1 %v1203_v33 }
 0x1a1   :  { %633 = vmatpush1.bf16.msra.mxu1 %v1207_v34 }
 0x237   :  { %v386_v46 = vpop.f32.mrb[0].mxu1 }
 0x238   :  { %v395_v48 = vrot.slane %v386_v46, 4  ;;  %v388_v49 = vpop.f32.mrb[1].mxu1 }
 0x239   :  { %v401_v50 = vrot.slane %v388_v49, 4  ;;  %v390_v52 = vpop.f32.mrb[2].mxu1 }
 0x23a   :  { %v396_v40 = vadd.f32 %v395_v48, %v386_v46  ;;  %v407_v61 = vrot.slane %v390_v52, 4  ;;  %v392_v45 = vpop.f32.mrb[3].mxu1 }
 0x23b   :  { %v402_v62 = vadd.f32 %v401_v50, %v388_v49  ;;  %v413_v63 = vrot.slane %v392_v45, 4 }
 0x23c   :  { %v397_v0 = vrot.slane %v396_v40, 2  ;;  %v408_v15 = vadd.f32 %v407_v61, %v390_v52 }
 0x23d   :  { %v403_v37 = vrot.slane %v402_v62, 2  ;;  %v414_v39 = vadd.f32 %v413_v63, %v392_v45 }
 0x23e   :  { %v398_v44 = vadd.f32 %v397_v0, %v396_v40  ;;  %v409_v43 = vrot.slane %v408_v15, 2 }
 0x23f   :  { %v404_v51 = vadd.f32 %v403_v37, %v402_v62  ;;  %v415_v38 = vrot.slane %v414_v39, 2 }
 0x240   :  { %v399_v54 = vrot.slane %v398_v44, 1  ;;  %v410_v55 = vadd.f32 %v409_v43, %v408_v15 }
 0x241   :  { %v405_v53 = vrot.slane %v404_v51, 1  ;;  %v416_v56 = vadd.f32 %v415_v38, %v414_v39 }
 0x242   :  { %v400_v57 = vadd.f32 %v399_v54, %v398_v44  ;;  %v411_v58 = vrot.slane %v410_v55, 1 }
 0x243   :  { %v406_v42 = vadd.f32 %v405_v53, %v404_v51  ;;  %v417_v60 = vrot.slane %v416_v56, 1 }
 0x244   :  { %v419_v59 = vmul.f32 0.125, %v400_v57  ;;  %v412_v48 = vadd.f32 %v411_v58, %v410_v55 }
 0x245   :  { %v420_v50 = vmul.f32 0.125, %v406_v42  ;;  %v418_v47 = vadd.f32 %v417_v60, %v416_v56 }
 0x246   :  { %v423_v41 = vsub.f32 %v386_v46, %v419_v59  ;;  %v421_v61 = vmul.f32 0.125, %v412_v48 }
 0x247   :  { %v424_v34 = vsub.f32 %v388_v49, %v420_v50  ;;  %v422_v63 = vmul.f32 0.125, %v418_v47 }
 0x248   :  { %v1305_v40 = vmul.f32 3.0, %v423_v41  ;;  %v425_v62 = vsub.f32 %v390_v52, %v421_v61 }
 0x249   :  { %v1307_v0 = vmul.f32 3.0, %v424_v34  ;;  %v426_v15 = vsub.f32 %v392_v45, %v422_v63 }
 0x24a   :  { %v439_v37 = vmul.f32 %v1305_v40, %v1209_v35  ;;  %v1311_v39 = vmul.f32 3.0, %v425_v62 }
 0x24b   :  { %v440_v44 = vmul.f32 %v1307_v0, %v1128_v13  ;;  %v1315_v43 = vmul.f32 3.0, %v426_v15 }
 0x24c   :  { %v443_v46 = vrot.slane %v439_v37, 4  ;;  %v441_v47 = vmul.f32 %v1311_v39, %v1211_v36 }
 0x24d   :  { %1433 = vst [vmem:[#allocation16_spill] sm:$0xff] %v1315_v43  ;;  %v449_v41 = vrot.slane %v440_v44, 4  ;;  %v442_v34 = vmul.f32 %v1315_v43, %v1130_v14 }
 0x24e   :  { %v444_v49 = vadd.f32 %v443_v46, %v439_v37  ;;  %v455_v52 = vrot.slane %v441_v47, 4 }
 0x24f   :  { %v450_v45 = vadd.f32 %v449_v41, %v440_v44  ;;  %v461_v51 = vrot.slane %v442_v34, 4 }
 0x250   :  { %v445_v38 = vrot.slane %v444_v49, 2  ;;  %v456_v54 = vadd.f32 %v455_v52, %v441_v47 }
 0x251   :  { %v451_v55 = vrot.slane %v450_v45, 2  ;;  %v462_v53 = vadd.f32 %v461_v51, %v442_v34 }
 0x252   :  { %v446_v56 = vadd.f32 %v445_v38, %v444_v49  ;;  %v457_v57 = vrot.slane %v456_v54, 2 }
 0x253   :  { %v463_v58 = vrot.slane %v462_v53, 2  ;;  %v452_v42 = vadd.f32 %v451_v55, %v450_v45 }
 0x254   :  { %v447_v60 = vrot.slane %v446_v56, 1  ;;  %v458_v59 = vadd.f32 %v457_v57, %v456_v54 }
 0x255   :  { %v453_v48 = vrot.slane %v452_v42, 1  ;;  %v464_v50 = vadd.f32 %v463_v58, %v462_v53  ;;  %v1435_v58 = vld [vmem:[#allocation16_spill] sm:$0xff] }
 0x256   :  { %v459_v61 = vrot.slane %v458_v59, 1  ;;  %v448_v63 = vadd.f32 %v447_v60, %v446_v56 }
 0x257   :  { %v454_v62 = vadd.f32 %v453_v48, %v452_v42  ;;  %v465_v15 = vrot.slane %v464_v50, 1  ;;  %v434_v42 = vmul.f32 0.5, %v1435_v58 }
 0x258   :  { %v460_v46 = vadd.f32 %v459_v61, %v458_v59  ;;  %v467_v41 = vmul.f32 %v448_v63, %v1209_v35  ;;  %v1436_v61 = vld [vmem:[#allocation12_spill] sm:$0xff] }
 0x259   :  { %v466_v43 = vadd.f32 %v465_v15, %v464_v50  ;;  %v468_v52 = vmul.f32 %v454_v62, %v1128_v13  ;;  %v1437_v62 = vld [vmem:[#allocation13_spill] sm:$0xff] }
 0x25a   :  { %v469_v51 = vmul.f32 %v460_v46, %v1211_v36  ;;  %v471_v38 = vsub.f32 %v439_v37, %v467_v41  ;;  %v432_v37 = vmul.f32 0.5, %v1307_v0  ;;  %v1438_v41 = vld [vmem:[#allocation14_spill] sm:$0xff] }
 0x25b   :  { %v470_v49 = vmul.f32 %v466_v43, %v1130_v14  ;;  %v472_v55 = vsub.f32 %v440_v44, %v468_v52 }
 0x25c   :  { %v473_v45 = vsub.f32 %v441_v47, %v469_v51  ;;  %v433_v47 = vmul.f32 0.5, %v1311_v39  ;;  %v436_v15 = vadd.f32 %v432_v37, %v1437_v62 }
 0x25d   :  { %v474_v54 = vsub.f32 %v442_v34, %v470_v49  ;;  %v1439_v49 = vld [vmem:[#allocation15_spill] sm:$0xff] }
 0x25e   :  { %v475_v57 = vpack.c.bf16 %v473_v45, %v471_v38  ;;  %v437_v0 = vadd.f32 %v433_v47, %v1438_v41  ;;  %v438_v38 = vadd.f32 %v434_v42, %v1439_v49 }
 0x25f   :  { %v476_v53 = vpack.c.bf16 %v474_v54, %v472_v55 }
 0x261   :  { %509 = vmatprep.mubr.bf16.mxu0 %v476_v53 }
 0x262   :  { %510 = vmatmul.mubr.bf16.vlgmr.msra.gmra.mrb[4].mxu0 %v475_v57 }
 0x263   :  { %728 = vmatpush1.bf16.msra.mxu0 %v1082_v1  ;;  %v1434_v1 = vld [vmem:[#allocation11_spill] sm:$0xff] }
 0x264   :  { %729 = vmatprep.subr.bf16.mxu0 %v1085_v2 }
 0x267   :  { %730 = vmatpush1.bf16.msra.mxu0 %v1089_v3 }
 0x268   :  { %731 = vmatprep.subr.bf16.mxu0 %v1093_v4 }
 0x26b   :  { %732 = vmatpush1.bf16.msra.mxu0 %v1097_v5 }
 0x26c   :  { %733 = vmatprep.subr.bf16.mxu0 %v1101_v6 }
 0x26f   :  { %734 = vmatpush1.bf16.msra.mxu0 %v1105_v7 }
 0x270   :  { %735 = vmatprep.subr.bf16.mxu0 %v1109_v8 }
 0x273   :  { %736 = vmatpush1.bf16.msra.mxu0 %v1113_v9 }
 0x274   :  { %737 = vmatprep.subr.bf16.mxu0 %v1117_v10 }
 0x277   :  { %738 = vmatpush1.bf16.msra.mxu0 %v1121_v11 }
 0x278   :  { %739 = vmatprep.subr.bf16.mxu0 %v1125_v12 }
 0x27b   :  { %740 = vmatpush1.bf16.msra.mxu0 %v1135_v16 }
 0x27c   :  { %741 = vmatprep.subr.bf16.mxu0 %v1139_v17 }
 0x27f   :  { %742 = vmatpush1.bf16.msra.mxu0 %v1143_v18 }
 0x280   :  { %743 = vmatprep.subr.bf16.mxu0 %v1147_v19 }
 0x283   :  { %744 = vmatpush1.bf16.msra.mxu0 %v1151_v20 }
 0x284   :  { %745 = vmatprep.subr.bf16.mxu0 %v1155_v21 }
 0x287   :  { %746 = vmatpush1.bf16.msra.mxu0 %v1159_v22 }
 0x288   :  { %747 = vmatprep.subr.bf16.mxu0 %v1163_v23 }
 0x28b   :  { %748 = vmatpush1.bf16.msra.mxu0 %v1167_v24 }
 0x28c   :  { %749 = vmatprep.subr.bf16.mxu0 %v1171_v25 }
 0x28f   :  { %750 = vmatpush1.bf16.msra.mxu0 %v1175_v26 }
 0x290   :  { %751 = vmatprep.subr.bf16.mxu0 %v1179_v27 }
 0x293   :  { %752 = vmatpush1.bf16.msra.mxu0 %v1183_v28 }
 0x294   :  { %753 = vmatprep.subr.bf16.mxu0 %v1187_v29 }
 0x297   :  { %754 = vmatpush1.bf16.msra.mxu0 %v1191_v30 }
 0x298   :  { %755 = vmatprep.subr.bf16.mxu0 %v1195_v31 }
 0x29b   :  { %756 = vmatpush1.bf16.msra.mxu0 %v1199_v32 }
 0x29c   :  { %757 = vmatprep.subr.bf16.mxu0 %v1203_v33  ;;  %v431_v33 = vmul.f32 0.5, %v1305_v40 }
 0x29e   :  { %v435_v63 = vadd.f32 %v431_v33, %v1436_v61 }
 0x29f   :  { %758 = vmatpush1.bf16.msra.mxu0 %v1434_v1 }
 0x335   :  { %v511_v2 = vpop.f32.mrb[4].mxu0 }
 0x336   :  { %v520_v3 = vrot.slane %v511_v2, 4  ;;  %v513_v4 = vpop.f32.mrb[5].mxu0 }
 0x337   :  { %v526_v5 = vrot.slane %v513_v4, 4  ;;  %v515_v6 = vpop.f32.mrb[6].mxu0 }
 0x338   :  { %v521_v7 = vadd.f32 %v520_v3, %v511_v2  ;;  %v532_v8 = vrot.slane %v515_v6, 4  ;;  %v517_v9 = vpop.f32.mrb[7].mxu0 }
 0x339   :  { %v527_v10 = vadd.f32 %v526_v5, %v513_v4  ;;  %v538_v11 = vrot.slane %v517_v9, 4 }
 0x33a   :  { %v522_v12 = vrot.slane %v521_v7, 2  ;;  %v533_v16 = vadd.f32 %v532_v8, %v515_v6 }
 0x33b   :  { %v528_v17 = vrot.slane %v527_v10, 2  ;;  %v539_v18 = vadd.f32 %v538_v11, %v517_v9 }
 0x33c   :  { %v523_v19 = vadd.f32 %v522_v12, %v521_v7  ;;  %v534_v20 = vrot.slane %v533_v16, 2 }
 0x33d   :  { %v529_v21 = vadd.f32 %v528_v17, %v527_v10  ;;  %v540_v22 = vrot.slane %v539_v18, 2 }
 0x33e   :  { %v524_v23 = vrot.slane %v523_v19, 1  ;;  %v535_v24 = vadd.f32 %v534_v20, %v533_v16 }
 0x33f   :  { %v530_v25 = vrot.slane %v529_v21, 1  ;;  %v541_v26 = vadd.f32 %v540_v22, %v539_v18 }
 0x340   :  { %v525_v27 = vadd.f32 %v524_v23, %v523_v19  ;;  %v536_v28 = vrot.slane %v535_v24, 1 }
 0x341   :  { %v531_v29 = vadd.f32 %v530_v25, %v529_v21  ;;  %v542_v30 = vrot.slane %v541_v26, 1 }
 0x342   :  { %v544_v31 = vmul.f32 0.125, %v525_v27  ;;  %v537_v32 = vadd.f32 %v536_v28, %v535_v24 }
 0x343   :  { %v545_v44 = vmul.f32 0.125, %v531_v29  ;;  %v543_v43 = vadd.f32 %v542_v30, %v541_v26 }
 0x344   :  { %v548_v34 = vsub.f32 %v511_v2, %v544_v31  ;;  %v546_v56 = vmul.f32 0.125, %v537_v32 }
 0x345   :  { %v549_v60 = vsub.f32 %v513_v4, %v545_v44  ;;  %v547_v59 = vmul.f32 0.125, %v543_v43 }
 0x346   :  { %v552_v48 = vmul.f32 3.0, %v548_v34  ;;  %v550_v50 = vsub.f32 %v515_v6, %v546_v56 }
 0x347   :  { %v553_v46 = vmul.f32 3.0, %v549_v60  ;;  %v551_v40 = vsub.f32 %v517_v9, %v547_v59 }
 0x348   :  { %v556_v52 = vmul.f32 0.16666667, %v552_v48  ;;  %v564_v51 = vmul.f32 %v552_v48, %v1209_v35  ;;  %v554_v39 = vmul.f32 3.0, %v550_v50 }
 0x349   :  { %v557_v45 = vmul.f32 0.16666667, %v553_v46  ;;  %v565_v55 = vmul.f32 %v553_v46, %v1128_v13  ;;  %v555_v54 = vmul.f32 3.0, %v551_v40 }
 0x34a   :  { %v1366_v57 = vadd.f32 %v556_v52, %v435_v63  ;;  %v568_v53 = vrot.slane %v564_v51, 4  ;;  %v558_v1 = vmul.f32 0.16666667, %v554_v39  ;;  %v566_v2 = vmul.f32 %v554_v39, %v1211_v36 }
 0x34b   :  { %v1369_v3 = vadd.f32 %v557_v45, %v436_v15  ;;  %v574_v4 = vrot.slane %v565_v55, 4  ;;  %v559_v5 = vmul.f32 0.16666667, %v555_v54  ;;  %v567_v6 = vmul.f32 %v555_v54, %v1130_v14 }
 0x34c   :  { %v569_v7 = vadd.f32 %v568_v53, %v564_v51  ;;  %v1372_v8 = vadd.f32 %v558_v1, %v437_v0  ;;  %v580_v9 = vrot.slane %v566_v2, 4 }
 0x34d   :  { %v575_v10 = vadd.f32 %v574_v4, %v565_v55  ;;  %v1374_v11 = vadd.f32 %v559_v5, %v438_v38  ;;  %v586_v12 = vrot.slane %v567_v6, 4 }
 0x34e   :  { %v570_v16 = vrot.slane %v569_v7, 2  ;;  %v581_v17 = vadd.f32 %v580_v9, %v566_v2 }
 0x34f   :  { %v576_v18 = vrot.slane %v575_v10, 2  ;;  %v587_v19 = vadd.f32 %v586_v12, %v567_v6 }
 0x350   :  { %v571_v20 = vadd.f32 %v570_v16, %v569_v7  ;;  %v582_v21 = vrot.slane %v581_v17, 2 }
 0x351   :  { %v588_v22 = vrot.slane %v587_v19, 2  ;;  %v577_v23 = vadd.f32 %v576_v18, %v575_v10 }
 0x352   :  { %v572_v24 = vrot.slane %v571_v20, 1  ;;  %v583_v25 = vadd.f32 %v582_v21, %v581_v17 }
 0x353   :  { %v578_v26 = vrot.slane %v577_v23, 1  ;;  %v589_v27 = vadd.f32 %v588_v22, %v587_v19 }
 0x354   :  { %v584_v28 = vrot.slane %v583_v25, 1  ;;  %v573_v29 = vadd.f32 %v572_v24, %v571_v20 }
 0x355   :  { %v579_v30 = vadd.f32 %v578_v26, %v577_v23  ;;  %v590_v31 = vrot.slane %v589_v27, 1 }
 0x356   :  { %v585_v32 = vadd.f32 %v584_v28, %v583_v25  ;;  %v592_v33 = vmul.f32 %v573_v29, %v1209_v35 }
 0x357   :  { %v591_v37 = vadd.f32 %v590_v31, %v589_v27  ;;  %v593_v44 = vmul.f32 %v579_v30, %v1128_v13 }
 0x358   :  { %v594_v43 = vmul.f32 %v585_v32, %v1211_v36  ;;  %v596_v34 = vsub.f32 %v564_v51, %v592_v33 }
 0x359   :  { %v595_v47 = vmul.f32 %v591_v37, %v1130_v14  ;;  %v597_v58 = vsub.f32 %v565_v55, %v593_v44 }
 0x35a   :  { %v598_v56 = vsub.f32 %v566_v2, %v594_v43 }
 0x35b   :  { %v599_v42 = vsub.f32 %v567_v6, %v595_v47 }
 0x35c   :  { %v600_v60 = vpack.c.bf16 %v598_v56, %v596_v34 }
 0x35d   :  { %v601_v59 = vpack.c.bf16 %v599_v42, %v597_v58 }
 0x35f   :  { %634 = vmatprep.mubr.bf16.mxu1 %v601_v59 }
 0x360   :  { %635 = vmatmul.mubr.bf16.vlgmr.msra.gmra.mrb[4].mxu1 %v600_v60 }
 0x433   :  { %v636_v48 = vpop.f32.mrb[4].mxu1 }
 0x434   :  { %v645_v50 = vrot.slane %v636_v48, 4  ;;  %v638_v61 = vpop.f32.mrb[5].mxu1 }
 0x435   :  { %v651_v63 = vrot.slane %v638_v61, 4  ;;  %v640_v62 = vpop.f32.mrb[6].mxu1 }
 0x436   :  { %v646_v15 = vadd.f32 %v645_v50, %v636_v48  ;;  %v657_v46 = vrot.slane %v640_v62, 4  ;;  %v642_v40 = vpop.f32.mrb[7].mxu1 }
 0x437   :  { %v652_v41 = vadd.f32 %v651_v63, %v638_v61  ;;  %v663_v0 = vrot.slane %v642_v40, 4 }
 0x438   :  { %v647_v52 = vrot.slane %v646_v15, 2  ;;  %v658_v39 = vadd.f32 %v657_v46, %v640_v62 }
 0x439   :  { %v653_v51 = vrot.slane %v652_v41, 2  ;;  %v664_v49 = vadd.f32 %v663_v0, %v642_v40 }
 0x43a   :  { %v648_v38 = vadd.f32 %v647_v52, %v646_v15  ;;  %v659_v45 = vrot.slane %v658_v39, 2 }
 0x43b   :  { %v654_v55 = vadd.f32 %v653_v51, %v652_v41  ;;  %v665_v54 = vrot.slane %v664_v49, 2 }
 0x43c   :  { %v649_v53 = vrot.slane %v648_v38, 1  ;;  %v660_v1 = vadd.f32 %v659_v45, %v658_v39 }
 0x43d   :  { %v655_v2 = vrot.slane %v654_v55, 1  ;;  %v666_v4 = vadd.f32 %v665_v54, %v664_v49 }
 0x43e   :  { %v650_v5 = vadd.f32 %v649_v53, %v648_v38  ;;  %v661_v6 = vrot.slane %v660_v1, 1 }
 0x43f   :  { %v656_v7 = vadd.f32 %v655_v2, %v654_v55  ;;  %v667_v9 = vrot.slane %v666_v4, 1 }
 0x440   :  { %v669_v10 = vmul.f32 0.125, %v650_v5  ;;  %v662_v12 = vadd.f32 %v661_v6, %v660_v1 }
 0x441   :  { %v670_v16 = vmul.f32 0.125, %v656_v7  ;;  %v668_v17 = vadd.f32 %v667_v9, %v666_v4 }
 0x442   :  { %v673_v18 = vsub.f32 %v636_v48, %v669_v10  ;;  %v671_v19 = vmul.f32 0.125, %v662_v12 }
 0x443   :  { %v674_v20 = vsub.f32 %v638_v61, %v670_v16  ;;  %v672_v21 = vmul.f32 0.125, %v668_v17 }
 0x444   :  { %v677_v22 = vmul.f32 3.0, %v673_v18  ;;  %v675_v23 = vsub.f32 %v640_v62, %v671_v19 }
 0x445   :  { %v678_v24 = vmul.f32 3.0, %v674_v20  ;;  %v676_v25 = vsub.f32 %v642_v40, %v672_v21 }
 0x446   :  { %v681_v26 = vmul.f32 0.041666668, %v677_v22  ;;  %v689_v27 = vmul.f32 %v677_v22, %v1209_v35  ;;  %v679_v28 = vmul.f32 3.0, %v675_v23 }
 0x447   :  { %v682_v29 = vmul.f32 0.041666668, %v678_v24  ;;  %v690_v30 = vmul.f32 %v678_v24, %v1128_v13  ;;  %v680_v31 = vmul.f32 3.0, %v676_v25 }
 0x448   :  { %v1383_v32 = vadd.f32 %v681_v26, %v1366_v57  ;;  %v693_v33 = vrot.slane %v689_v27, 4  ;;  %v683_v37 = vmul.f32 0.041666668, %v679_v28  ;;  %v691_v44 = vmul.f32 %v679_v28, %v1211_v36 }
 0x449   :  { %v1387_v43 = vadd.f32 %v682_v29, %v1369_v3  ;;  %v699_v47 = vrot.slane %v690_v30, 4  ;;  %v684_v34 = vmul.f32 0.041666668, %v680_v31  ;;  %v692_v56 = vmul.f32 %v680_v31, %v1130_v14 }
 0x44a   :  { %v694_v58 = vadd.f32 %v693_v33, %v689_v27  ;;  %v1391_v42 = vadd.f32 %v683_v37, %v1372_v8  ;;  %v705_v60 = vrot.slane %v691_v44, 4 }
 0x44b   :  { %v700_v59 = vadd.f32 %v699_v47, %v690_v30  ;;  %v1394_v57 = vadd.f32 %v684_v34, %v1374_v11  ;;  %v711_v48 = vrot.slane %v692_v56, 4 }
 0x44c   :  { %v695_v50 = vrot.slane %v694_v58, 2  ;;  %v706_v61 = vadd.f32 %v705_v60, %v691_v44 }
 0x44d   :  { %v701_v63 = vrot.slane %v700_v59, 2  ;;  %v712_v62 = vadd.f32 %v711_v48, %v692_v56 }
 0x44e   :  { %v696_v3 = vadd.f32 %v695_v50, %v694_v58  ;;  %v707_v15 = vrot.slane %v706_v61, 2 }
 0x44f   :  { %v713_v46 = vrot.slane %v712_v62, 2  ;;  %v702_v40 = vadd.f32 %v701_v63, %v700_v59 }
 0x450   :  { %v697_v41 = vrot.slane %v696_v3, 1  ;;  %v708_v0 = vadd.f32 %v707_v15, %v706_v61 }
 0x451   :  { %v714_v52 = vadd.f32 %v713_v46, %v712_v62  ;;  %v703_v39 = vrot.slane %v702_v40, 1 }
 0x452   :  { %v709_v8 = vrot.slane %v708_v0, 1  ;;  %v698_v51 = vadd.f32 %v697_v41, %v696_v3 }
 0x453   :  { %v704_v49 = vadd.f32 %v703_v39, %v702_v40  ;;  %v715_v38 = vrot.slane %v714_v52, 1 }
 0x454   :  { %v710_v45 = vadd.f32 %v709_v8, %v708_v0  ;;  %v717_v11 = vmul.f32 %v698_v51, %v1209_v35 }
 0x455   :  { %v716_v55 = vadd.f32 %v715_v38, %v714_v52  ;;  %v718_v54 = vmul.f32 %v704_v49, %v1128_v13 }
 0x456   :  { %v719_v53 = vmul.f32 %v710_v45, %v1211_v36  ;;  %v721_v2 = vsub.f32 %v689_v27, %v717_v11 }
 0x457   :  { %v720_v1 = vmul.f32 %v716_v55, %v1130_v14  ;;  %v722_v5 = vsub.f32 %v690_v30, %v718_v54 }
 0x458   :  { %v723_v4 = vsub.f32 %v691_v44, %v719_v53 }
 0x459   :  { %v724_v6 = vsub.f32 %v692_v56, %v720_v1 }
 0x45a   :  { %v725_v7 = vpack.c.bf16 %v723_v4, %v721_v2 }
 0x45b   :  { %v726_v9 = vpack.c.bf16 %v724_v6, %v722_v5 }
 0x45d   :  { %759 = vmatprep.mubr.bf16.mxu0 %v726_v9 }
 0x45e   :  { %760 = vmatmul.mubr.bf16.vlgmr.msra.gmra.mrb[8].mxu0 %v725_v7 }
 0x531   :  { %v761_v10 = vpop.f32.mrb[8].mxu0 }
 0x532   :  { %v770_v12 = vrot.slane %v761_v10, 4  ;;  %v763_v16 = vpop.f32.mrb[9].mxu0 }
 0x533   :  { %v776_v17 = vrot.slane %v763_v16, 4  ;;  %v765_v35 = vpop.f32.mrb[10].mxu0 }
 0x534   :  { %v771_v18 = vadd.f32 %v770_v12, %v761_v10  ;;  %v782_v19 = vrot.slane %v765_v35, 4  ;;  %v767_v13 = vpop.f32.mrb[11].mxu0 }
 0x535   :  { %v777_v20 = vadd.f32 %v776_v17, %v763_v16  ;;  %v788_v36 = vrot.slane %v767_v13, 4 }
 0x536   :  { %v772_v21 = vrot.slane %v771_v18, 2  ;;  %v783_v14 = vadd.f32 %v782_v19, %v765_v35 }
 0x537   :  { %v778_v22 = vrot.slane %v777_v20, 2  ;;  %v789_v23 = vadd.f32 %v788_v36, %v767_v13 }
 0x538   :  { %v773_v24 = vadd.f32 %v772_v21, %v771_v18  ;;  %v784_v25 = vrot.slane %v783_v14, 2 }
 0x539   :  { %v779_v26 = vadd.f32 %v778_v22, %v777_v20  ;;  %v790_v27 = vrot.slane %v789_v23, 2 }
 0x53a   :  { %v774_v28 = vrot.slane %v773_v24, 1  ;;  %v785_v29 = vadd.f32 %v784_v25, %v783_v14 }
 0x53b   :  { %v780_v30 = vrot.slane %v779_v26, 1  ;;  %v791_v31 = vadd.f32 %v790_v27, %v789_v23 }
 0x53c   :  { %v775_v33 = vadd.f32 %v774_v28, %v773_v24  ;;  %v786_v37 = vrot.slane %v785_v29, 1 }
 0x53d   :  { %v781_v44 = vadd.f32 %v780_v30, %v779_v26  ;;  %v792_v47 = vrot.slane %v791_v31, 1 }
 0x53e   :  { %v794_v34 = vmul.f32 0.125, %v775_v33  ;;  %v787_v56 = vadd.f32 %v786_v37, %v785_v29 }
 0x53f   :  { %v795_v58 = vmul.f32 0.125, %v781_v44  ;;  %v793_v60 = vadd.f32 %v792_v47, %v791_v31 }
 0x540   :  { %v798_v59 = vsub.f32 %v761_v10, %v794_v34  ;;  %v796_v48 = vmul.f32 0.125, %v787_v56 }
 0x541   :  { %v799_v50 = vsub.f32 %v763_v16, %v795_v58  ;;  %v797_v61 = vmul.f32 0.125, %v793_v60 }
 0x542   :  { %v802_v63 = vmul.f32 3.0, %v798_v59  ;;  %v800_v62 = vsub.f32 %v765_v35, %v796_v48 }
 0x543   :  { %v803_v3 = vmul.f32 3.0, %v799_v50  ;;  %v801_v15 = vsub.f32 %v767_v13, %v797_v61 }
 0x544   :  { %v806_v46 = vmul.f32 0.008333334, %v802_v63  ;;  %v804_v40 = vmul.f32 3.0, %v800_v62 }
 0x545   :  { %v807_v41 = vmul.f32 0.008333334, %v803_v3  ;;  %v805_v0 = vmul.f32 3.0, %v801_v15 }
 0x546   :  { %v810_v52 = vadd.f32 %v806_v46, %v1383_v32  ;;  %v808_v39 = vmul.f32 0.008333334, %v804_v40 }
 0x547   :  { %v811_v8 = vadd.f32 %v807_v41, %v1387_v43  ;;  %v809_v51 = vmul.f32 0.008333334, %v805_v0 }
 0x548   :  { %v814_v49 = vrot.slane %v810_v52, 4  ;;  %v812_v38 = vadd.f32 %v808_v39, %v1391_v42 }
 0x549   :  { %v820_v45 = vrot.slane %v811_v8, 4  ;;  %v813_v11 = vadd.f32 %v809_v51, %v1394_v57 }
 0x54a   :  { %v815_v55 = vadd.f32 %v814_v49, %v810_v52  ;;  %v826_v54 = vrot.slane %v812_v38, 4 }
 0x54b   :  { %v821_v53 = vadd.f32 %v820_v45, %v811_v8  ;;  %v832_v1 = vrot.slane %v813_v11, 4 }
 0x54c   :  { %v816_v2 = vrot.slane %v815_v55, 2  ;;  %v827_v4 = vadd.f32 %v826_v54, %v812_v38 }
 0x54d   :  { %v822_v5 = vrot.slane %v821_v53, 2  ;;  %v833_v6 = vadd.f32 %v832_v1, %v813_v11 }
 0x54e   :  { %v817_v7 = vadd.f32 %v816_v2, %v815_v55  ;;  %v828_v32 = vrot.slane %v827_v4, 2 }
 0x54f   :  { %v823_v9 = vadd.f32 %v822_v5, %v821_v53  ;;  %v834_v10 = vrot.slane %v833_v6, 2 }
 0x550   :  { %v818_v43 = vrot.slane %v817_v7, 1  ;;  %v829_v12 = vadd.f32 %v828_v32, %v827_v4 }
 0x551   :  { %v824_v16 = vrot.slane %v823_v9, 1  ;;  %v835_v17 = vadd.f32 %v834_v10, %v833_v6 }
 0x552   :  { %v830_v42 = vrot.slane %v829_v12, 1  ;;  %v819_v35 = vadd.f32 %v818_v43, %v817_v7 }
 0x553   :  { %v836_v18 = vrot.slane %v835_v17, 1  ;;  %v825_v57 = vadd.f32 %v824_v16, %v823_v9 }
 0x554   :  { %v831_v19 = vadd.f32 %v830_v42, %v829_v12  ;;  %v838_v13 = vmul.f32 0.125, %v819_v35 }
 0x555   :  { %v837_v20 = vadd.f32 %v836_v18, %v835_v17  ;;  %v839_v36 = vmul.f32 0.125, %v825_v57 }
 0x556   :  { %v840_v21 = vmul.f32 0.125, %v831_v19  ;;  %v842_v14 = vsub.f32 %v810_v52, %v838_v13 }
 0x557   :  { %v841_v22 = vmul.f32 0.125, %v837_v20  ;;  %v843_v23 = vsub.f32 %v811_v8, %v839_v36 }
 0x558   :  { %v844_v24 = vsub.f32 %v812_v38, %v840_v21  ;;  %v846_v25 = vmul.f32 3.0, %v842_v14 }
 0x559   :  { %v845_v26 = vsub.f32 %v813_v11, %v841_v22  ;;  %v847_v27 = vmul.f32 3.0, %v843_v23 }
 0x55a   :  { %v848_v28 = vmul.f32 3.0, %v844_v24  ;;  %850 = vst [vmem:[#allocation7] sm:$0xff] %v846_v25 }
 0x55b   :  { %v849_v29 = vmul.f32 3.0, %v845_v26  ;;  %851 = vst [vmem:[#allocation7 + $0x8] sm:$0xff] %v847_v27 }
 0x55c   :  { %852 = vst [vmem:[#allocation7 + $0x10] sm:$0xff] %v848_v28 }
 0x55d   :  { %853 = vst [vmem:[#allocation7 + $0x18] sm:$0xff] %v849_v29 }
 0x55e   :  { %1014 = shalt.err (!%p1011_p6)
}
 0x55f   :  { %s1015_s12 = scalar_lea.hbm %s1421_s2, 512 }
 0x560   :  { %p1016_p7 = scmp.ne.s32.totalorder %s1421_s2, %s1015_s12  ;;  %p1019_p8 = scmp.lt.u32.totalorder %s1015_s12, %s1421_s2 }
 0x562   :  { %p1021_p9 = pnand %p1019_p8, %p1016_p7 }
 0x564   :  { %1024 = shalt.err (!%p1021_p9)
}
 0x565   :  { %865 = dma.vmem_to_hbm [thread:$0]  %s860_s8, 512, %s1421_s2, [#allocation4], %s1032_s19, %s1032_s19, %s1033_s20  }
 0x566   :  { %1029 = dma.done.wait [#allocation4], 512  }
 0x567   :  { %1030 = vsyncadd [#allocation4], 4294966784 }
 0x568   :  { %869 = vsyncpa [#allocation3], 1 }
 0x569   :  { %870 = vsyncpa [#allocation6], 1 }
 0x56a   :  { %871 = vsyncpa [#allocation4], 1 }

</bundles_post_ra>
